<compile_context>
chip_gen: v7x
topology: tpu7x:2x2x1
jax: 0.10.0
libtpu: 0.0.40
codegen_flags: <defaults>
</compile_context>

<pallas_src>
import functools

import jax
import jax.numpy as jnp
from jax.experimental import pallas as pl
from jax.experimental.pallas import tpu as pltpu

HIDDEN = 128


# ----------------------------- Pallas kernel ------------------------------ #

def topkast_mlp_kernel(xt_ref, w1_ref, b1_ref, w2_ref, b2_ref, w3_ref, b3_ref,
                       o_ref):
    """One batch tile (batch on lanes):
       h1t = relu(W1 @ xt + b1); h2t = relu(W2 @ h1t + b2);
       out_row[1, TB] = sum_sublane(h2t * w3_col) + b3."""
    # Layer 1: [128,16] bf16 @ [16,TB] bf16 -> [128,TB] f32 (MXU, f32 acc).
    h1 = jnp.dot(w1_ref[...], xt_ref[...], preferred_element_type=jnp.float32)
    h1 = jnp.maximum(h1 + b1_ref[...], 0.0)                 # b1: [128,1] bcast

    # Layer 2: [128,128] bf16 @ [128,TB] bf16 -> [128,TB] f32 (MXU, f32 acc).
    h2 = jnp.dot(w2_ref[...], h1.astype(jnp.bfloat16),
                 preferred_element_type=jnp.float32)
    h2 = jnp.maximum(h2 + b2_ref[...], 0.0)                 # b2: [128,1] bcast

    # Layer 3: out_features == 1 -> VPU multiply + sublane (XLU) reduce in f32.
    # Produces a lane-dense [1, TB] row; scalar bias read from SMEM.
    o_ref[...] = jnp.sum(h2 * w3_ref[...], axis=0, keepdims=True) + b3_ref[0, 0]


@functools.partial(jax.jit, static_argnames=("block_b",))
def topkast_net_forward(xt, w1, b1, w2, b2, w3_col, b3, *, block_b=256):
    """xt: [F_in, B] bf16 (batch on lanes); w1: [H, F_in] bf16; w2: [H, H] bf16;
    b1/b2: [H, 1] f32; w3_col: [H, 1] f32; b3: [1, 1] f32 -> out [B, 1] f32."""
    f_in, batch = xt.shape
    hidden = w1.shape[0]

    tb = block_b
    num_tiles = pl.cdiv(batch, tb)
    padded = num_tiles * tb
    if padded != batch:
        # Prefer block_b dividing the batch (or pad at data-prep time); this
        # fallback costs an extra HBM copy of xt.
        xt = jnp.pad(xt, ((0, 0), (0, padded - batch)))
    grid = (num_tiles,)

    cost = pl.CostEstimate(
        flops=2 * padded * (f_in * hidden + hidden * hidden + hidden),
        transcendentals=0,
        bytes_accessed=(padded * f_in * 2                      # xt (bf16)
                        + (f_in * hidden + hidden * hidden) * 2  # W1, W2 (bf16)
                        + hidden * 4 * 3 + 4                     # b1, b2, w3, b3
                        + padded * 4))                           # out (f32)

    out_row = pl.pallas_call(
        topkast_mlp_kernel,
        out_shape=jax.ShapeDtypeStruct((1, padded), jnp.float32),
        grid=grid,
        in_specs=[
            # Batch-tiled activation stream (lane-dense: 256 lanes/block).
            pl.BlockSpec((f_in, tb), lambda i: (0, i)),
            # Weights / biases: constant index_map -> fetched once, VMEM-resident.
            pl.BlockSpec((hidden, f_in), lambda i: (0, 0)),      # W1 (bf16)
            pl.BlockSpec((hidden, 1), lambda i: (0, 0)),         # b1 (f32)
            pl.BlockSpec((hidden, hidden), lambda i: (0, 0)),    # W2 (bf16)
            pl.BlockSpec((hidden, 1), lambda i: (0, 0)),         # b2 (f32)
            pl.BlockSpec((hidden, 1), lambda i: (0, 0)),         # W3 column (f32)
            # Scalar bias of the final layer: SMEM, read as a scalar.
            pl.BlockSpec((1, 1), lambda i: (0, 0),
                         memory_space=pltpu.MemorySpace.SMEM),
        ],
        # Lane-dense output row: last block dim = tb (multiple of 128).
        out_specs=pl.BlockSpec((1, tb), lambda i: (0, i)),
        compiler_params=pltpu.CompilerParams(
            dimension_semantics=("parallel",)),
        cost_estimate=cost,
    )(xt, w1, b1, w2, b2, w3_col, b3)
    return out_row[0, :batch].reshape(batch, 1)


# --------------------------- Parameter setup ------------------------------ #

def topkast_mask(w, p_forward):
    """Keep exactly the top (1 - p_forward) fraction of entries by |magnitude|
    (exact k via top_k, matching torch.topk tie behaviour up to ordering)."""
    n = w.size
    k = max(1, int(round((1.0 - p_forward) * n)))
    _, idx = jax.lax.top_k(jnp.abs(w).ravel(), k)
    keep = jnp.zeros((n,), jnp.bool_).at[idx].set(True).reshape(w.shape)
    return jnp.where(keep, w, jnp.zeros_like(w))


def init_topkast_linear(key, in_features, out_features, p_forward):
    """nn.Linear-style init (uniform +/- 1/sqrt(fan_in)), then apply the
    TopKAST forward mask. Returns (W [out, in], b [out, 1]) in f32."""
    kw, kb = jax.random.split(key)
    bound = 1.0 / jnp.sqrt(jnp.float32(in_features))
    w = jax.random.uniform(kw, (out_features, in_features), jnp.float32,
                           minval=-bound, maxval=bound)   # PyTorch [out, in]
    b = jax.random.uniform(kb, (out_features,), jnp.float32,
                           minval=-bound, maxval=bound)
    w_sparse = topkast_mask(w, p_forward)
    return w_sparse, b.reshape(out_features, 1)            # [out, in], [out, 1]


# --------------------------------- main ------------------------------------ #

if __name__ == "__main__":
    in_features = 16
    batch = 512          # 2 grid steps of TB=256: one per TC on v7x
    hidden = HIDDEN

    root = jax.random.PRNGKey(0)
    kx, k1, k2, k3 = jax.random.split(root, 4)

    # Input [batch, in_features] (flattened features, as nn.Linear expects).
    x = jax.random.normal(kx, (batch, in_features), jnp.float32)

    # layer_in:  in_features -> 128, p_forward=0.6
    w1, b1 = init_topkast_linear(k1, in_features, hidden, p_forward=0.6)
    # hidden1:   128 -> 128,         p_forward=0.7
    w2, b2 = init_topkast_linear(k2, hidden, hidden, p_forward=0.7)
    # layer_out: 128 -> 1,           p_forward=0.6
    w3, b3 = init_topkast_linear(k3, hidden, 1, p_forward=0.6)

    # Kernel-side layouts / dtypes: batch-on-lanes, bf16 matmul operands,
    # f32 everything else.  Transpose of x done once at data-prep time.
    xt_bf = x.T.astype(jnp.bfloat16)          # [F_in, B]
    w1_bf = w1.astype(jnp.bfloat16)           # [128, 16]
    w2_bf = w2.astype(jnp.bfloat16)           # [128, 128]
    w3_col = w3.T                             # [1,128] -> [128,1], f32
    # b3 is already [1, 1] f32 (SMEM scalar).

    out = topkast_net_forward(xt_bf, w1_bf, b1, w2_bf, b2, w3_col, b3,
                              block_b=256)
    out = jax.block_until_ready(out)
    assert out.shape == (batch, 1)

    # Reference computed with identical bf16-operand / f32-accumulate path.
    ref_h1t = jnp.maximum(
        jnp.dot(w1_bf, xt_bf, preferred_element_type=jnp.float32) + b1, 0.0)
    ref_h2t = jnp.maximum(
        jnp.dot(w2_bf, ref_h1t.astype(jnp.bfloat16),
                preferred_element_type=jnp.float32) + b2, 0.0)
    ref = (jnp.sum(ref_h2t * w3_col, axis=0, keepdims=True) + b3[0, 0]).T
    assert jnp.allclose(out, ref, atol=2e-3, rtol=2e-3)

    # Loose sanity check against the pure-f32 forward (bf16 rounding only).
    ref32 = jnp.maximum(x @ w1.T + b1.T, 0.0)
    ref32 = jnp.maximum(ref32 @ w2.T + b2.T, 0.0)
    ref32 = ref32 @ w3.T + b3.T
    assert jnp.allclose(out, ref32, atol=5e-2, rtol=5e-2)

    print("KERNEL_OK")
</pallas_src>

<mosaic_0001>
module attributes {stable_mosaic.version = 11 : i64} {
  func.func @topkast_mlp_kernel(%arg0: i32, %arg1: memref<16x256xbf16, #tpu.memory_space<vmem>>, %arg2: memref<128x16xbf16, #tpu.memory_space<vmem>>, %arg3: memref<128x1xf32, #tpu.memory_space<vmem>>, %arg4: memref<128x128xbf16, #tpu.memory_space<vmem>>, %arg5: memref<128x1xf32, #tpu.memory_space<vmem>>, %arg6: memref<128x1xf32, #tpu.memory_space<vmem>>, %arg7: memref<1x1xf32, #tpu.memory_space<smem>>, %arg8: memref<1x256xf32, #tpu.memory_space<vmem>>) attributes {dimension_semantics = [#tpu.dimension_semantics<parallel>], iteration_bounds = array<i64: 2>, scalar_prefetch = 0 : i64, scratch_operands = 0 : i64, tpu.core_type = #tpu.core_type<tc>, window_params = [{transform_indices = @transform_0, window_bounds = array<i64: 16, 256>}, {pipeline_mode = #tpu.pipeline_mode<synchronous>, transform_indices = @transform_1, window_bounds = array<i64: 128, 16>}, {pipeline_mode = #tpu.pipeline_mode<synchronous>, transform_indices = @transform_2, window_bounds = array<i64: 128, 1>}, {pipeline_mode = #tpu.pipeline_mode<synchronous>, transform_indices = @transform_3, window_bounds = array<i64: 128, 128>}, {pipeline_mode = #tpu.pipeline_mode<synchronous>, transform_indices = @transform_4, window_bounds = array<i64: 128, 1>}, {pipeline_mode = #tpu.pipeline_mode<synchronous>, transform_indices = @transform_5, window_bounds = array<i64: 128, 1>}, {transform_indices = @transform_6, window_bounds = array<i64: 1, 1>}, {transform_indices = @transform_7, window_bounds = array<i64: 1, 256>}]} {
    %c0 = arith.constant 0 : index
    %c0_0 = arith.constant 0 : index
    %0 = vector.load %arg2[%c0, %c0_0] : memref<128x16xbf16, #tpu.memory_space<vmem>>, vector<128x16xbf16>
    %c0_1 = arith.constant 0 : index
    %c0_2 = arith.constant 0 : index
    %1 = vector.load %arg1[%c0_1, %c0_2] : memref<16x256xbf16, #tpu.memory_space<vmem>>, vector<16x256xbf16>
    %cst = arith.constant dense<0.000000e+00> : vector<128x256xf32>
    %2 = tpu.matmul %0, %1, %cst {dimension_numbers = #tpu.dot_dimension_numbers<[1], [0], [0], [1], [0, 0, 1, 1], [], []>} : vector<128x16xbf16>, vector<16x256xbf16>, vector<128x256xf32> -> vector<128x256xf32>
    %c0_3 = arith.constant 0 : index
    %c0_4 = arith.constant 0 : index
    %3 = vector.load %arg3[%c0_3, %c0_4] : memref<128x1xf32, #tpu.memory_space<vmem>>, vector<128x1xf32>
    %4 = vector.broadcast %3 : vector<128x1xf32> to vector<128x256xf32>
    %5 = arith.addf %2, %4 : vector<128x256xf32>
    %cst_5 = arith.constant 0.000000e+00 : f32
    %6 = vector.broadcast %cst_5 : f32 to vector<128x256xf32>
    %7 = arith.maximumf %5, %6 : vector<128x256xf32>
    %c0_6 = arith.constant 0 : index
    %c0_7 = arith.constant 0 : index
    %8 = vector.load %arg4[%c0_6, %c0_7] : memref<128x128xbf16, #tpu.memory_space<vmem>>, vector<128x128xbf16>
    %9 = arith.truncf %7 : vector<128x256xf32> to vector<128x256xbf16>
    %cst_8 = arith.constant dense<0.000000e+00> : vector<128x256xf32>
    %10 = tpu.matmul %8, %9, %cst_8 {dimension_numbers = #tpu.dot_dimension_numbers<[1], [0], [0], [1], [0, 0, 1, 1], [], []>} : vector<128x128xbf16>, vector<128x256xbf16>, vector<128x256xf32> -> vector<128x256xf32>
    %c0_9 = arith.constant 0 : index
    %c0_10 = arith.constant 0 : index
    %11 = vector.load %arg5[%c0_9, %c0_10] : memref<128x1xf32, #tpu.memory_space<vmem>>, vector<128x1xf32>
    %12 = vector.broadcast %11 : vector<128x1xf32> to vector<128x256xf32>
    %13 = arith.addf %10, %12 : vector<128x256xf32>
    %cst_11 = arith.constant 0.000000e+00 : f32
    %14 = vector.broadcast %cst_11 : f32 to vector<128x256xf32>
    %15 = arith.maximumf %13, %14 : vector<128x256xf32>
    %c0_12 = arith.constant 0 : index
    %c0_13 = arith.constant 0 : index
    %16 = vector.load %arg6[%c0_12, %c0_13] : memref<128x1xf32, #tpu.memory_space<vmem>>, vector<128x1xf32>
    %17 = vector.broadcast %16 : vector<128x1xf32> to vector<128x256xf32>
    %18 = arith.mulf %15, %17 : vector<128x256xf32>
    %cst_14 = arith.constant dense<0.000000e+00> : vector<256xf32>
    %19 = vector.multi_reduction <add>, %18, %cst_14 [0] : vector<128x256xf32> to vector<256xf32>
    %20 = vector.shape_cast %19 : vector<256xf32> to vector<1x256xf32>
    %c0_15 = arith.constant 0 : index
    %c0_16 = arith.constant 0 : index
    %21 = memref.load %arg7[%c0_15, %c0_16] : memref<1x1xf32, #tpu.memory_space<smem>>
    %22 = vector.broadcast %21 : f32 to vector<1x256xf32>
    %23 = arith.addf %20, %22 : vector<1x256xf32>
    %c0_17 = arith.constant 0 : index
    %c0_18 = arith.constant 0 : index
    %24 = vector.load %arg8[%c0_17, %c0_18] : memref<1x256xf32, #tpu.memory_space<vmem>>, vector<1x256xf32>
    tpu.vector_store %arg8[%c0_17, %c0_18], %23 {strides = array<i32>} : memref<1x256xf32, #tpu.memory_space<vmem>>, vector<1x256xf32>,
    return
  }
  func.func @transform_0(%arg0: i32) -> (i32, i32) {
    %c0_i32 = arith.constant 0 : i32
    %c0_i32_0 = arith.constant 0 : i32
    return %c0_i32, %arg0 : i32, i32
  }
  func.func @transform_1(%arg0: i32) -> (i32, i32) {
    %c0_i32 = arith.constant 0 : i32
    %c0_i32_0 = arith.constant 0 : i32
    %c0_i32_1 = arith.constant 0 : i32
    return %c0_i32, %c0_i32_0 : i32, i32
  }
  func.func @transform_2(%arg0: i32) -> (i32, i32) {
    %c0_i32 = arith.constant 0 : i32
    %c0_i32_0 = arith.constant 0 : i32
    %c0_i32_1 = arith.constant 0 : i32
    return %c0_i32, %c0_i32_0 : i32, i32
  }
  func.func @transform_3(%arg0: i32) -> (i32, i32) {
    %c0_i32 = arith.constant 0 : i32
    %c0_i32_0 = arith.constant 0 : i32
    %c0_i32_1 = arith.constant 0 : i32
    return %c0_i32, %c0_i32_0 : i32, i32
  }
  func.func @transform_4(%arg0: i32) -> (i32, i32) {
    %c0_i32 = arith.constant 0 : i32
    %c0_i32_0 = arith.constant 0 : i32
    %c0_i32_1 = arith.constant 0 : i32
    return %c0_i32, %c0_i32_0 : i32, i32
  }
  func.func @transform_5(%arg0: i32) -> (i32, i32) {
    %c0_i32 = arith.constant 0 : i32
    %c0_i32_0 = arith.constant 0 : i32
    %c0_i32_1 = arith.constant 0 : i32
    return %c0_i32, %c0_i32_0 : i32, i32
  }
  func.func @transform_6(%arg0: i32) -> (i32, i32) {
    %c0_i32 = arith.constant 0 : i32
    %c0_i32_0 = arith.constant 0 : i32
    %c0_i32_1 = arith.constant 0 : i32
    return %c0_i32, %c0_i32_0 : i32, i32
  }
  func.func @transform_7(%arg0: i32) -> (i32, i32) {
    %c0_i32 = arith.constant 0 : i32
    %c0_i32_0 = arith.constant 0 : i32
    return %c0_i32, %arg0 : i32, i32
  }
}

</mosaic_0001>

<bundles_post_ra>
// kernel: topkast_net_forward.1
= control target key start
LH: loop header
LB: loop body
LE: loop exit
PB: predicated region body
PF: predicated region fallthrough
CT: control target
= control target key end

     0   :  { %s1826_s0 = inlined_call_operand.vmem [shape: bf16[16,512], index: 0, kind: input, shape index: {}]   ;;  %s1827_s1 = inlined_call_operand.vmem [shape: bf16[128,16], index: 1, kind: input, shape index: {}]   ;;  %s1828_s2 = inlined_call_operand.vmem [shape: f32[128,1], index: 2, kind: input, shape index: {}]   ;;  %s1829_s3 = inlined_call_operand.vmem [shape: bf16[128,128], index: 3, kind: input, shape index: {}]   ;;  %s1830_s4 = inlined_call_operand.vmem [shape: f32[128,1], index: 4, kind: input, shape index: {}]   ;;  %s1831_s5 = inlined_call_operand.vmem [shape: f32[128,1], index: 5, kind: input, shape index: {}]   ;;  %s1832_s6 = inlined_call_operand.<no memory space> [shape: f32[1,1], index: 6, kind: input, shape index: {}]   ;;  %s1833_s7 = inlined_call_operand.hbm [shape: f32[1,512], index: 7, kind: output, shape index: {}]  }
   0x1   :  { %12 = sst [smem:[#allocation2]] %s1832_s6 }
   0x2   :  { %13 = vsyncpa [#allocation5], 0 }
   0x3   :  { %15 = vsyncpa [#allocation5 + $0x1], 0  ;;  %s1482_s26 = smov 0   ;;  %s1484_s27 = smov 0  }
   0x4   :  { %s1486_s28 = smov 0   ;;  %s1488_s29 = smov 0  }
   0x5 LB: > { %s1251_s6 = sadd.s32 4294967295, %s1434_s29   ;;  %s1252_s30 = sadd.s32 4294967294, %s1434_s29   ;;  %s1434_s29 = sphi %s1488_s29, %s1839_s29   ;;  %s1430_s28 = sphi %s1486_s28, %s1838_s28   ;;  %s1426_s27 = sphi %s1484_s27, %s1837_s27   ;;  %s1422_s26 = sphi %s1482_s26, %s1836_s26  }
   0x6   : > { %s1505_s8 = sadd.s32 1, %s1434_s29   ;;  %s28_s9 = sadd.s32 1, %s1430_s28 }
   0x7   : > { %s25_s10 = ssub.s32 %s1434_s29, %s1505_s8  ;;  %p35_p0 = scmp.ne.s32.totalorder %s1430_s28, %s1426_s27 }
   0x8   : > { %p26_p1 = scmp.eq.s32.totalorder %s25_s10, 0  ;;  %p36_p2 = scmp.eq.s32.totalorder %s1434_s29, 0 }
   0x9   : > { %p191_p3 = scmp.eq.s32.totalorder %s1251_s6, 1  ;;  %p196_p4 = scmp.ne.s32.totalorder %s1426_s27, %s1422_s26 }
   0xa   : > { %s1518_s11 = scalar_select %p26_p1, %s1430_s28, %s28_s9  }
   0xb   : > { %p37_p5 = por %p36_p2, %p35_p0  ;;  %p1520_p6 = por %p191_p3, %p35_p0 }
   0xc   : > { %p197_p7 = scmp.eq.s32.totalorder %s1252_s30, 1  ;;  %p1254_p9 = scmp.ge.s32.totalorder %s1434_s29, 2 }
   0xe   : > { %p1524_p8 = por %p197_p7, %p196_p4  ;;  %231 = sbr.rel (%p1254_p9) target bundleno = 28 (0x1c), region = 40 }
  0x15   : > { %234 = sbr.rel (!%p37_p5) target bundleno = 28 (0x1c), region = 44  ;;  %s236_s14 = sand.u32 (%p37_p5), 1, %s1430_s28  }
  0x16   : > { %s1292_s15 = sshll.u32 (%p37_p5), %s1434_s29, 3  ;;  %s1255_s16 = sshll.u32 (%p37_p5), %s236_s14, 4 }
  0x17   : > { %s241_s19 = scalar_lea.vmem (%p37_p5), %s1826_s0, %s1292_s15  ;;  %s238_s20 = scalar_lea.vmem (%p37_p5), [#allocation3], %s1255_s16 }
  0x18   : > { %v271_v0 = vld [vmem:[%s241_s19] sm:$0xff] (%p37_p5)  ;;  %v273_v1 = vld [vmem:[%s241_s19 + $0x10] sm:$0xff] (%p37_p5) }
  0x19   : > { %272 = vst [vmem:[%s238_s20] sm:$0xff] (%p37_p5), %v271_v0  ;;  %274 = vst [vmem:[%s238_s20 + $0x8] sm:$0xff] (%p37_p5), %v273_v1 }
  0x1c PF: > { %p1258_p10 = scmp.ge.s32.totalorder %s1434_s29, 1  ;;  %p279_p11 = scmp.lt.s32.totalorder %s1434_s29, 3 }
  0x1e   : > { %p280_p12 = pnand %p1258_p10, %p279_p11 }
  0x1f   : > { %s1539_s21 = sand.u32 (!%p280_p12), 1, %s1426_s27   ;;  %v1436_v2 = vmov (!%p280_p12), 0   ;;  %v338_v3 = vld [vmem:[%s1828_s2] sm:$0xff] (!%p280_p12)  ;;  %v339_v4 = vld [vmem:[%s1828_s2 + $0x8] sm:$0xff] (!%p280_p12)  ;;  %v340_v7 = vld [vmem:[%s1828_s2 + $0x10] sm:$0xff] (!%p280_p12)  ;;  %vm484_vm0 = vcmask (!%p280_p12), 130048  }
  0x20   : > { %283 = sbr.rel (%p280_p12) target bundleno = 625 (0x271), region = 82  ;;  %s1259_s22 = sshll.u32 (!%p280_p12), %s1539_s21, 4  ;;  %541 = vmatprep.mubr.bf16.mxu0 (!%p280_p12), %v1436_v2  ;;  %1351 = vset.pattern.permute.xlu0 (!%p280_p12), %v1436_v2  ;;  %v1356_v8 = vld [vmem:[%s1827_s1] sm:$0xff] (!%p280_p12)   ;;  %v341_v9 = vld [vmem:[%s1828_s2 + $0x18] sm:$0xff] (!%p280_p12)  ;;  %v343_v11 = vld [vmem:[%s1828_s2 + $0x28] sm:$0xff] (!%p280_p12) }
  0x21   : > { %356 = vperm.xlu0 (!%p280_p12), %1351, %v338_v3   ;;  %1352 = vset.pattern.permute.xlu1 (!%p280_p12), %v1436_v2  ;;  %s288_s9 = scalar_lea.vmem (!%p280_p12), [#allocation3], %s1259_s22  ;;  %v342_v10 = vld [vmem:[%s1828_s2 + $0x20] sm:$0xff] (!%p280_p12)  ;;  %v344_v12 = vld [vmem:[%s1828_s2 + $0x30] sm:$0xff] (!%p280_p12)  ;;  %v1357_v13 = vld [vmem:[%s1827_s1 + $0x8] sm:$0xff] (!%p280_p12)   ;;  %s1145_s30 = sld [smem:[#allocation2]] (!%p280_p12) }
  0x22   : > { %v1353_v5 = vld [vmem:[%s288_s9 + $0x4] ss:$8 sps:$4 sm:$0xff] (!%p280_p12)   ;;  %872 = vmatprep.mubr.bf16.mxu1 (!%p280_p12), %v1436_v2  ;;  %v1355_v6 = vld [vmem:[%s288_s9] ss:$8 sps:$4 sm:$0xff] (!%p280_p12)   ;;  %366 = vperm.xlu1 (!%p280_p12), %1352, %v340_v7   ;;  %s1260_s9 = sshll.u32 (!%p280_p12), %s1539_s21, 1  ;;  %s1293_s10 = sshll.u32 (!%p280_p12), %s1251_s6, 5 }
  0x23   : > { %509 = vmatprep.subr.bf16.mxu0 (!%p280_p12), %v1353_v5  ;;  %v345_v14 = vld [vmem:[%s1828_s2 + $0x38] sm:$0xff] (!%p280_p12)  ;;  %v346_v15 = vld [vmem:[%s1828_s2 + $0x40] sm:$0xff] (!%p280_p12)  ;;  %v347_v16 = vld [vmem:[%s1828_s2 + $0x48] sm:$0xff] (!%p280_p12)  ;;  %s316_s14 = scalar_lea.vmem (!%p280_p12), [#allocation4], %s1260_s9  ;;  %s1782_s18 = scalar_lea.hbm (!%p280_p12), %s1833_s7, %s1293_s10 }
  0x24   : > { %510 = vmatpush1.bf16.msra.mxu0 (!%p280_p12), %v1355_v6  ;;  %v348_v17 = vld [vmem:[%s1828_s2 + $0x50] sm:$0xff] (!%p280_p12)  ;;  %v349_v19 = vld [vmem:[%s1828_s2 + $0x58] sm:$0xff] (!%p280_p12)  ;;  %v350_v20 = vld [vmem:[%s1828_s2 + $0x60] sm:$0xff] (!%p280_p12)  ;;  %s1187_s15 = sshll.u32 (!%p280_p12), %s316_s14, 4  ;;  %s1173_s19 = scalar_lea.sflag (!%p280_p12), [#allocation5], %s1539_s21  ;;  %s1784_s15 = int_to_ptr.vmem [resolvable:$true] %s1187_s15 }
  0x25   : > { %361 = vperm.xlu0 (!%p280_p12), %1351, %v339_v4   ;;  %v1358_v18 = vld [vmem:[%s1827_s1 + $0x10] sm:$0xff] (!%p280_p12)   ;;  %v351_v22 = vld [vmem:[%s1828_s2 + $0x68] sm:$0xff] (!%p280_p12)  ;;  %v1359_v23 = vld [vmem:[%s1827_s1 + $0x18] sm:$0xff] (!%p280_p12)   ;;  %s1372_s20 = scalar_lea.vmem (!%p280_p12), %s1784_s15, 32  ;;  %s1438_s6 = smov (!%p280_p12), [#allocation4]  }
  0x26   : > { %371 = vperm.xlu1 (!%p280_p12), %1352, %v341_v9   ;;  %v352_v21 = vld [vmem:[%s1828_s2 + $0x70] sm:$0xff] (!%p280_p12)  ;;  %v353_v24 = vld [vmem:[%s1828_s2 + $0x78] sm:$0xff] (!%p280_p12)  ;;  %v686_v25 = vld [vmem:[%s1830_s4] sm:$0xff] (!%p280_p12)  ;;  %p1373_p13 = scmp.ne.s32.totalorder (!%p280_p12), %s1784_s15, %s1372_s20  ;;  %s1376_s22 = sshll.u32 (!%p280_p12), %s1438_s6, 4  ;;  %s1377_s22 = int_to_ptr.vmem [resolvable:$false] %s1376_s22 }
  0x27   : > { %1271 = vmatmul.mubr.msk.bf16.vlgmr.msra.gmra.mrb[0].mxu0 %vm484_vm0, %v1356_v8  ;;  %v687_v26 = vld [vmem:[%s1830_s4 + $0x8] sm:$0xff]  ;;  %v688_v27 = vld [vmem:[%s1830_s4 + $0x10] sm:$0xff]  ;;  %v1360_v28 = vld [vmem:[%s1827_s1 + $0x20] sm:$0xff]   ;;  %s1378_s23 = scalar_lea.vmem %s1377_s22, 64  ;;  %p1379_p2 = scmp.lt.s32.totalorder %s1784_s15, %s1377_s22 }
  0x28   : > { %551 = vmatprep.mubr.bf16.mxu0 %v1436_v2  ;;  %v689_v29 = vld [vmem:[%s1830_s4 + $0x18] sm:$0xff]  ;;  %v975_v30 = vld [vmem:[%s1831_s5] sm:$0xff]  ;;  %v976_v31 = vld [vmem:[%s1831_s5 + $0x8] sm:$0xff]  ;;  %p1374_p0 = pnand %p1373_p13, %p1520_p6  ;;  %p1380_p3 = scmp.lt.s32.totalorder %s1378_s23, %s1372_s20 }
  0x29   : > { %376 = vperm.xlu0 %1351, %v342_v10   ;;  %v690_v32 = vld [vmem:[%s1830_s4 + $0x20] sm:$0xff]  ;;  %v1361_v33 = vld [vmem:[%s1827_s1 + $0x28] sm:$0xff]   ;;  %v977_v34 = vld [vmem:[%s1831_s5 + $0x10] sm:$0xff] }
  0x2a   : > { %381 = vperm.xlu1 %1352, %v343_v11   ;;  %v691_v35 = vld [vmem:[%s1830_s4 + $0x28] sm:$0xff]  ;;  %v978_v36 = vld [vmem:[%s1831_s5 + $0x18] sm:$0xff]  ;;  %v692_v37 = vld [vmem:[%s1830_s4 + $0x30] sm:$0xff]  ;;  %p1375_p1 = pneg %p1374_p0  ;;  %p1381_p4 = por %p1380_p3, %p1379_p2 }
  0x2b   : > { %v1362_v38 = vld [vmem:[%s1827_s1 + $0x30] sm:$0xff]   ;;  %v979_v39 = vld [vmem:[%s1831_s5 + $0x20] sm:$0xff]  ;;  %v693_v40 = vld [vmem:[%s1830_s4 + $0x38] sm:$0xff] }
  0x2c   : > { %v980_v41 = vld [vmem:[%s1831_s5 + $0x28] sm:$0xff]  ;;  %v694_v42 = vld [vmem:[%s1830_s4 + $0x40] sm:$0xff]  ;;  %v1363_v43 = vld [vmem:[%s1827_s1 + $0x38] sm:$0xff]   ;;  %p1382_p5 = pnand %p1381_p4, %p1375_p1 }
  0x2d   : > { %386 = vperm.xlu0 %1351, %v344_v12   ;;  %v981_v44 = vld [vmem:[%s1831_s5 + $0x30] sm:$0xff]  ;;  %v695_v45 = vld [vmem:[%s1830_s4 + $0x48] sm:$0xff]  ;;  %v982_v46 = vld [vmem:[%s1831_s5 + $0x38] sm:$0xff] }
  0x2e   : > { %391 = vperm.xlu1 %1352, %v345_v14   ;;  %v696_v47 = vld [vmem:[%s1830_s4 + $0x50] sm:$0xff]  ;;  %v983_v48 = vld [vmem:[%s1831_s5 + $0x40] sm:$0xff]  ;;  %v697_v49 = vld [vmem:[%s1830_s4 + $0x58] sm:$0xff] }
  0x2f   : > { %1272 = vmatmul.mubr.msk.bf16.gmra.mrb[4].mxu0 %vm484_vm0, %v1357_v13  ;;  %v984_v50 = vld [vmem:[%s1831_s5 + $0x48] sm:$0xff]  ;;  %v698_v51 = vld [vmem:[%s1830_s4 + $0x60] sm:$0xff]  ;;  %v985_v52 = vld [vmem:[%s1831_s5 + $0x50] sm:$0xff] }
  0x30   : > { %561 = vmatprep.mubr.bf16.mxu0 %v1436_v2  ;;  %v699_v53 = vld [vmem:[%s1830_s4 + $0x68] sm:$0xff]  ;;  %v986_v54 = vld [vmem:[%s1831_s5 + $0x58] sm:$0xff]  ;;  %v700_v55 = vld [vmem:[%s1830_s4 + $0x70] sm:$0xff] }
  0x31   : > { %396 = vperm.xlu0 %1351, %v346_v15   ;;  %v987_v56 = vld [vmem:[%s1831_s5 + $0x60] sm:$0xff]  ;;  %v701_v57 = vld [vmem:[%s1830_s4 + $0x78] sm:$0xff]  ;;  %v988_v58 = vld [vmem:[%s1831_s5 + $0x68] sm:$0xff] }
  0x32   : > { %401 = vperm.xlu1 %1352, %v347_v16   ;;  %v989_v59 = vld [vmem:[%s1831_s5 + $0x70] sm:$0xff]  ;;  %v990_v60 = vld [vmem:[%s1831_s5 + $0x78] sm:$0xff] }
  0x35   : > { %406 = vperm.xlu0 %1351, %v348_v17  }
  0x36   : > { %411 = vperm.xlu1 %1352, %v349_v19  }
  0x37   : > { %1273 = vmatmul.mubr.msk.bf16.gmra.mrb[8].mxu0 %vm484_vm0, %v1358_v18 }
  0x38   : > { %571 = vmatprep.mubr.bf16.mxu0 %v1436_v2 }
  0x39   : > { %416 = vperm.xlu0 %1351, %v350_v20  }
  0x3a   : > { %421 = vperm.xlu1 %1352, %v351_v22  }
  0x3d   : > { %426 = vperm.xlu0 %1351, %v352_v21  }
  0x3e   : > { %431 = vperm.xlu1 %1352, %v353_v24  }
  0x3f   : > { %1274 = vmatmul.mubr.msk.bf16.gmra.mrb[12].mxu0 %vm484_vm0, %v1359_v23 }
  0x40   : > { %581 = vmatprep.mubr.bf16.mxu0 %v1436_v2 }
  0x41   : > { %704 = vperm.xlu0 %1351, %v686_v25  }
  0x42   : > { %709 = vperm.xlu1 %1352, %v687_v26  }
  0x45   : > { %714 = vperm.xlu0 %1351, %v688_v27  }
  0x46   : > { %719 = vperm.xlu1 %1352, %v689_v29  }
  0x47   : > { %1275 = vmatmul.mubr.msk.bf16.gmra.mrb[16].mxu0 %vm484_vm0, %v1360_v28 }
  0x48   : > { %591 = vmatprep.mubr.bf16.mxu0 %v1436_v2 }
  0x49   : > { %993 = vperm.xlu0 %1351, %v975_v30  }
  0x4a   : > { %998 = vperm.xlu1 %1352, %v976_v31  }
  0x4d   : > { %724 = vperm.xlu0 %1351, %v690_v32  }
  0x4e   : > { %1003 = vperm.xlu1 %1352, %v977_v34  }
  0x4f   : > { %1276 = vmatmul.mubr.msk.bf16.gmra.mrb[20].mxu0 %vm484_vm0, %v1361_v33 }
  0x50   : > { %601 = vmatprep.mubr.bf16.mxu0 %v1436_v2 }
  0x51   : > { %729 = vperm.xlu0 %1351, %v691_v35  }
  0x52   : > { %1008 = vperm.xlu1 %1352, %v978_v36  }
  0x55   : > { %734 = vperm.xlu0 %1351, %v692_v37  }
  0x56   : > { %1013 = vperm.xlu1 %1352, %v979_v39  }
  0x57   : > { %1277 = vmatmul.mubr.msk.bf16.gmra.mrb[24].mxu0 %vm484_vm0, %v1362_v38 }
  0x58   : > { %611 = vmatprep.mubr.bf16.mxu0 %v1436_v2 }
  0x59   : > { %739 = vperm.xlu0 %1351, %v693_v40  }
  0x5a   : > { %1018 = vperm.xlu1 %1352, %v980_v41  }
  0x5d   : > { %744 = vperm.xlu0 %1351, %v694_v42  }
  0x5e   : > { %1023 = vperm.xlu1 %1352, %v981_v44  }
  0x5f   : > { %1278 = vmatmul.mubr.msk.bf16.gmra.mrb[28].mxu0 %vm484_vm0, %v1363_v43 }
  0x60   : > { %862 = vmatprep.mubr.bf16.mxu0 %v1436_v2 }
  0x61   : > { %749 = vperm.xlu0 %1351, %v695_v45  }
  0x62   : > { %1028 = vperm.xlu1 %1352, %v982_v46  }
  0x65   : > { %754 = vperm.xlu0 %1351, %v696_v47  }
  0x66   : > { %1033 = vperm.xlu1 %1352, %v983_v48  }
  0x69   : > { %759 = vperm.xlu0 %1351, %v697_v49  }
  0x6a   : > { %1038 = vperm.xlu1 %1352, %v984_v50  }
  0x6d   : > { %764 = vperm.xlu0 %1351, %v698_v51  }
  0x6e   : > { %1043 = vperm.xlu1 %1352, %v985_v52  }
  0x71   : > { %769 = vperm.xlu0 %1351, %v699_v53  }
  0x72   : > { %1048 = vperm.xlu1 %1352, %v986_v54  }
  0x75   : > { %774 = vperm.xlu0 %1351, %v700_v55  }
  0x76   : > { %1053 = vperm.xlu1 %1352, %v987_v56  }
  0x79   : > { %779 = vperm.xlu0 %1351, %v701_v57  }
  0x7a   : > { %1058 = vperm.xlu1 %1352, %v988_v58  }
  0x7d   : > { %1063 = vperm.xlu0 %1351, %v989_v59  }
  0x7e   : > { %1068 = vperm.xlu1 %1352, %v990_v60  }
  0xa0   : > { %v357_v61 = vpop.permute.xlu0 %356 }
  0xa1   : > { %v367_v7 = vpop.permute.xlu1 %366 }
  0xa4   : > { %v362_v1 = vpop.permute.xlu0 %361 }
  0xa5   : > { %v372_v18 = vpop.permute.xlu1 %371 }
  0xa8   : > { %v377_v29 = vpop.permute.xlu0 %376 }
  0xa9   : > { %v382_v34 = vpop.permute.xlu1 %381 }
  0xac   : > { %v387_v45 = vpop.permute.xlu0 %386 }
  0xad   : > { %v392_v50 = vpop.permute.xlu1 %391 }
  0xfa   : > { %v543_v62 = vpop.f32.mrb[0].mxu0 }
  0xfb   : > { %v544_v63 = vadd.f32 %v543_v62, %v357_v61  ;;  %v545_v0 = vpop.f32.mrb[1].mxu0 }
  0xfc   : > { %v546_v3 = vadd.f32 %v545_v0, %v357_v61  ;;  %v547_v4 = vpop.f32.mrb[2].mxu0  ;;  %v397_v61 = vpop.permute.xlu0 %396 }
  0xfd   : > { %v548_v5 = vadd.f32 %v547_v4, %v362_v1  ;;  %v549_v6 = vpop.f32.mrb[3].mxu0  ;;  %v622_v9 = vmax.f32 %v544_v63, 0.0 }
  0xfe   : > { %v550_v8 = vadd.f32 %v549_v6, %v362_v1  ;;  %v623_v11 = vmax.f32 %v546_v3, 0.0  ;;  %v402_v3 = vpop.permute.xlu1 %401 }
  0xff   : > { %v624_v10 = vmax.f32 %v548_v5, 0.0 }
 0x100   : > { %v625_v12 = vmax.f32 %v550_v8, 0.0 }
 0x101   : > { %v670_v13 = vpack.c.bf16 %v624_v10, %v622_v9 }
 0x102   : > { %v671_v14 = vpack.c.bf16 %v625_v12, %v623_v11  ;;  %v553_v15 = vpop.f32.mrb[4].mxu0 }
 0x103   : > { %v554_v16 = vadd.f32 %v553_v15, %v367_v7  ;;  %v555_v17 = vpop.f32.mrb[5].mxu0 }
 0x104   : > { %v556_v19 = vadd.f32 %v555_v17, %v367_v7  ;;  %v557_v20 = vpop.f32.mrb[6].mxu0  ;;  %830 = vmatprep.subr.bf16.mxu0 %v671_v14  ;;  %1294 = vmatprep.subr.bf16.mxu1 %v671_v14  ;;  %v407_v14 = vpop.permute.xlu0 %406 }
 0x105   : > { %v558_v21 = vadd.f32 %v557_v20, %v372_v18  ;;  %v559_v22 = vpop.f32.mrb[7].mxu0  ;;  %831 = vmatpush1.bf16.msra.mxu0 %v670_v13  ;;  %1302 = vmatpush1.bf16.msra.mxu1 %v670_v13  ;;  %v626_v24 = vmax.f32 %v554_v16, 0.0 }
 0x106   : > { %v560_v23 = vadd.f32 %v559_v22, %v372_v18  ;;  %v627_v26 = vmax.f32 %v556_v19, 0.0  ;;  %v412_v19 = vpop.permute.xlu1 %411 }
 0x107   : > { %v628_v25 = vmax.f32 %v558_v21, 0.0 }
 0x108   : > { %v629_v27 = vmax.f32 %v560_v23, 0.0 }
 0x109   : > { %v672_v28 = vpack.c.bf16 %v628_v25, %v626_v24 }
 0x10a   : > { %v673_v30 = vpack.c.bf16 %v629_v27, %v627_v26  ;;  %v563_v31 = vpop.f32.mrb[8].mxu0 }
 0x10b   : > { %v564_v32 = vadd.f32 %v563_v31, %v377_v29  ;;  %v565_v33 = vpop.f32.mrb[9].mxu0 }
 0x10c   : > { %v566_v35 = vadd.f32 %v565_v33, %v377_v29  ;;  %v567_v36 = vpop.f32.mrb[10].mxu0  ;;  %832 = vmatprep.subr.bf16.mxu0 %v673_v30  ;;  %1295 = vmatprep.subr.bf16.mxu1 %v673_v30  ;;  %v417_v30 = vpop.permute.xlu0 %416 }
 0x10d   : > { %v568_v37 = vadd.f32 %v567_v36, %v382_v34  ;;  %v569_v38 = vpop.f32.mrb[11].mxu0  ;;  %833 = vmatpush1.bf16.msra.mxu0 %v672_v28  ;;  %1303 = vmatpush1.bf16.msra.mxu1 %v672_v28  ;;  %v630_v40 = vmax.f32 %v564_v32, 0.0 }
 0x10e   : > { %v570_v39 = vadd.f32 %v569_v38, %v382_v34  ;;  %v631_v42 = vmax.f32 %v566_v35, 0.0  ;;  %v422_v35 = vpop.permute.xlu1 %421 }
 0x10f   : > { %v632_v41 = vmax.f32 %v568_v37, 0.0 }
 0x110   : > { %v633_v43 = vmax.f32 %v570_v39, 0.0 }
 0x111   : > { %v674_v44 = vpack.c.bf16 %v632_v41, %v630_v40 }
 0x112   : > { %v675_v46 = vpack.c.bf16 %v633_v43, %v631_v42  ;;  %v573_v47 = vpop.f32.mrb[12].mxu0 }
 0x113   : > { %v574_v48 = vadd.f32 %v573_v47, %v387_v45  ;;  %v575_v49 = vpop.f32.mrb[13].mxu0 }
 0x114   : > { %v576_v51 = vadd.f32 %v575_v49, %v387_v45  ;;  %v577_v52 = vpop.f32.mrb[14].mxu0  ;;  %834 = vmatprep.subr.bf16.mxu0 %v675_v46  ;;  %1296 = vmatprep.subr.bf16.mxu1 %v675_v46  ;;  %v427_v46 = vpop.permute.xlu0 %426 }
 0x115   : > { %v578_v53 = vadd.f32 %v577_v52, %v392_v50  ;;  %v579_v54 = vpop.f32.mrb[15].mxu0  ;;  %835 = vmatpush1.bf16.msra.mxu0 %v674_v44  ;;  %1304 = vmatpush1.bf16.msra.mxu1 %v674_v44  ;;  %v634_v56 = vmax.f32 %v574_v48, 0.0 }
 0x116   : > { %v580_v55 = vadd.f32 %v579_v54, %v392_v50  ;;  %v635_v58 = vmax.f32 %v576_v51, 0.0  ;;  %v432_v51 = vpop.permute.xlu1 %431 }
 0x117   : > { %v636_v57 = vmax.f32 %v578_v53, 0.0 }
 0x118   : > { %v637_v59 = vmax.f32 %v580_v55, 0.0 }
 0x119   : > { %v676_v60 = vpack.c.bf16 %v636_v57, %v634_v56 }
 0x11a   : > { %v677_v62 = vpack.c.bf16 %v637_v59, %v635_v58  ;;  %v583_v63 = vpop.f32.mrb[16].mxu0 }
 0x11b   : > { %v584_v0 = vadd.f32 %v583_v63, %v397_v61  ;;  %v585_v1 = vpop.f32.mrb[17].mxu0  ;;  %v1364_v63 = vld [vmem:[%s1829_s3] sm:$0xff]  }
 0x11c   : > { %v586_v4 = vadd.f32 %v585_v1, %v397_v61  ;;  %v587_v5 = vpop.f32.mrb[18].mxu0  ;;  %836 = vmatprep.subr.bf16.mxu0 %v677_v62  ;;  %1297 = vmatprep.subr.bf16.mxu1 %v677_v62  ;;  %v1366_v1 = vld [vmem:[%s1829_s3 + $0x10] sm:$0xff]  }
 0x11d   : > { %v588_v6 = vadd.f32 %v587_v5, %v402_v3  ;;  %v589_v7 = vpop.f32.mrb[19].mxu0  ;;  %837 = vmatpush1.bf16.msra.mxu0 %v676_v60  ;;  %1305 = vmatpush1.bf16.msra.mxu1 %v676_v60  ;;  %v638_v9 = vmax.f32 %v584_v0, 0.0  ;;  %v1365_v0 = vld [vmem:[%s1829_s3 + $0x8] sm:$0xff]  }
 0x11e   : > { %v590_v8 = vadd.f32 %v589_v7, %v402_v3  ;;  %v639_v11 = vmax.f32 %v586_v4, 0.0  ;;  %v1367_v3 = vld [vmem:[%s1829_s3 + $0x18] sm:$0xff]   ;;  %v1368_v4 = vld [vmem:[%s1829_s3 + $0x20] sm:$0xff]   ;;  %v1369_v5 = vld [vmem:[%s1829_s3 + $0x28] sm:$0xff]  }
 0x11f   : > { %v640_v10 = vmax.f32 %v588_v6, 0.0  ;;  %v1370_v6 = vld [vmem:[%s1829_s3 + $0x30] sm:$0xff]   ;;  %v1371_v7 = vld [vmem:[%s1829_s3 + $0x38] sm:$0xff]  }
 0x120   : > { %v641_v12 = vmax.f32 %v590_v8, 0.0  ;;  %v705_v8 = vpop.permute.xlu0 %704 }
 0x121   : > { %v678_v13 = vpack.c.bf16 %v640_v10, %v638_v9  ;;  %v710_v9 = vpop.permute.xlu1 %709 }
 0x122   : > { %v679_v15 = vpack.c.bf16 %v641_v12, %v639_v11  ;;  %v593_v16 = vpop.f32.mrb[20].mxu0 }
 0x123   : > { %v594_v17 = vadd.f32 %v593_v16, %v407_v14  ;;  %v595_v18 = vpop.f32.mrb[21].mxu0 }
 0x124   : > { %v596_v20 = vadd.f32 %v595_v18, %v407_v14  ;;  %v597_v21 = vpop.f32.mrb[22].mxu0  ;;  %838 = vmatprep.subr.bf16.mxu0 %v679_v15  ;;  %1298 = vmatprep.subr.bf16.mxu1 %v679_v15  ;;  %v715_v10 = vpop.permute.xlu0 %714 }
 0x125   : > { %v598_v22 = vadd.f32 %v597_v21, %v412_v19  ;;  %v599_v23 = vpop.f32.mrb[23].mxu0  ;;  %839 = vmatpush1.bf16.msra.mxu0 %v678_v13  ;;  %1306 = vmatpush1.bf16.msra.mxu1 %v678_v13  ;;  %v642_v25 = vmax.f32 %v594_v17, 0.0  ;;  %v720_v11 = vpop.permute.xlu1 %719 }
 0x126   : > { %v600_v24 = vadd.f32 %v599_v23, %v412_v19  ;;  %v643_v27 = vmax.f32 %v596_v20, 0.0 }
 0x127   : > { %v644_v26 = vmax.f32 %v598_v22, 0.0 }
 0x128   : > { %v645_v28 = vmax.f32 %v600_v24, 0.0  ;;  %v994_v12 = vpop.permute.xlu0 %993 }
 0x129   : > { %v680_v29 = vpack.c.bf16 %v644_v26, %v642_v25  ;;  %v999_v13 = vpop.permute.xlu1 %998 }
 0x12a   : > { %v681_v31 = vpack.c.bf16 %v645_v28, %v643_v27  ;;  %v603_v32 = vpop.f32.mrb[24].mxu0 }
 0x12b   : > { %v604_v33 = vadd.f32 %v603_v32, %v417_v30  ;;  %v605_v34 = vpop.f32.mrb[25].mxu0 }
 0x12c   : > { %v606_v36 = vadd.f32 %v605_v34, %v417_v30  ;;  %v607_v37 = vpop.f32.mrb[26].mxu0  ;;  %840 = vmatprep.subr.bf16.mxu0 %v681_v31  ;;  %1299 = vmatprep.subr.bf16.mxu1 %v681_v31  ;;  %v725_v14 = vpop.permute.xlu0 %724 }
 0x12d   : > { %v608_v38 = vadd.f32 %v607_v37, %v422_v35  ;;  %v609_v39 = vpop.f32.mrb[27].mxu0  ;;  %841 = vmatpush1.bf16.msra.mxu0 %v680_v29  ;;  %1307 = vmatpush1.bf16.msra.mxu1 %v680_v29  ;;  %v646_v41 = vmax.f32 %v604_v33, 0.0  ;;  %v1004_v15 = vpop.permute.xlu1 %1003 }
 0x12e   : > { %v610_v40 = vadd.f32 %v609_v39, %v422_v35  ;;  %v647_v43 = vmax.f32 %v606_v36, 0.0 }
 0x12f   : > { %v648_v42 = vmax.f32 %v608_v38, 0.0 }
 0x130   : > { %v649_v44 = vmax.f32 %v610_v40, 0.0  ;;  %v730_v16 = vpop.permute.xlu0 %729 }
 0x131   : > { %v682_v45 = vpack.c.bf16 %v648_v42, %v646_v41  ;;  %v1009_v17 = vpop.permute.xlu1 %1008 }
 0x132   : > { %v683_v47 = vpack.c.bf16 %v649_v44, %v647_v43  ;;  %v613_v48 = vpop.f32.mrb[28].mxu0 }
 0x133   : > { %v614_v49 = vadd.f32 %v613_v48, %v427_v46  ;;  %v615_v50 = vpop.f32.mrb[29].mxu0 }
 0x134   : > { %v616_v52 = vadd.f32 %v615_v50, %v427_v46  ;;  %v617_v53 = vpop.f32.mrb[30].mxu0  ;;  %842 = vmatprep.subr.bf16.mxu0 %v683_v47  ;;  %1300 = vmatprep.subr.bf16.mxu1 %v683_v47  ;;  %v1760_v18 = vpop.permute.xlu0 %734 }
 0x135   : > { %v618_v54 = vadd.f32 %v617_v53, %v432_v51  ;;  %v619_v55 = vpop.f32.mrb[31].mxu0  ;;  %843 = vmatpush1.bf16.msra.mxu0 %v682_v45  ;;  %1308 = vmatpush1.bf16.msra.mxu1 %v682_v45  ;;  %v650_v57 = vmax.f32 %v614_v49, 0.0  ;;  %v1014_v19 = vpop.permute.xlu1 %1013 }
 0x136   : > { %v620_v56 = vadd.f32 %v619_v55, %v432_v51  ;;  %v651_v59 = vmax.f32 %v616_v52, 0.0 }
 0x137   : > { %v652_v58 = vmax.f32 %v618_v54, 0.0 }
 0x138   : > { %v653_v60 = vmax.f32 %v620_v56, 0.0  ;;  %v1762_v20 = vpop.permute.xlu0 %739 }
 0x139   : > { %v684_v61 = vpack.c.bf16 %v652_v58, %v650_v57 }
 0x13a   : > { %v685_v62 = vpack.c.bf16 %v653_v60, %v651_v59 }
 0x13c   : > { %844 = vmatprep.subr.bf16.mxu0 %v685_v62  ;;  %1301 = vmatprep.subr.bf16.mxu1 %v685_v62  ;;  %v1764_v21 = vpop.permute.xlu0 %744 }
 0x13d   : > { %845 = vmatpush1.bf16.msra.mxu0 %v684_v61  ;;  %1309 = vmatpush1.bf16.msra.mxu1 %v684_v61 }
 0x140   : > { %863 = vmatmul.mubr.bf16.vlgmr.msra.gmra.mrb[32].mxu0 %v1364_v63  ;;  %873 = vmatmul.mubr.bf16.vlgmr.msra.gmra.mrb[0].mxu1 %v1365_v0  ;;  %v1766_v52 = vpop.permute.xlu0 %749 }
 0x141   : > { %882 = vmatprep.mubr.bf16.mxu1 %v1436_v2 }
 0x148   : > { %883 = vmatmul.mubr.bf16.gmra.mrb[4].mxu1 %v1366_v1 }
 0x149   : > { %892 = vmatprep.mubr.bf16.mxu1 %v1436_v2 }
 0x150   : > { %893 = vmatmul.mubr.bf16.gmra.mrb[8].mxu1 %v1367_v3 }
 0x151   : > { %902 = vmatprep.mubr.bf16.mxu1 %v1436_v2 }
 0x158   : > { %903 = vmatmul.mubr.bf16.gmra.mrb[12].mxu1 %v1368_v4 }
 0x159   : > { %912 = vmatprep.mubr.bf16.mxu1 %v1436_v2 }
 0x160   : > { %913 = vmatmul.mubr.bf16.gmra.mrb[16].mxu1 %v1369_v5 }
 0x161   : > { %922 = vmatprep.mubr.bf16.mxu1 %v1436_v2 }
 0x168   : > { %923 = vmatmul.mubr.bf16.gmra.mrb[20].mxu1 %v1370_v6 }
 0x169   : > { %932 = vmatprep.mubr.bf16.mxu1 %v1436_v2  ;;  %v1019_v2 = vpop.permute.xlu1 %1018 }
 0x16d   : > { %v1024_v37 = vpop.permute.xlu1 %1023 }
 0x170   : > { %933 = vmatmul.mubr.bf16.gmra.mrb[24].mxu1 %v1371_v7 }
 0x171   : > { %v1029_v57 = vpop.permute.xlu1 %1028 }
 0x213   : > { %v864_v22 = vpop.f32.mrb[32].mxu0  ;;  %v874_v23 = vpop.f32.mrb[0].mxu1 }
 0x214   : > { %v865_v24 = vadd.f32 %v864_v22, %v705_v8  ;;  %v875_v25 = vadd.f32 %v874_v23, %v715_v10  ;;  %v866_v26 = vpop.f32.mrb[33].mxu0  ;;  %v876_v27 = vpop.f32.mrb[1].mxu1 }
 0x215   : > { %v867_v28 = vadd.f32 %v866_v26, %v705_v8  ;;  %v877_v29 = vadd.f32 %v876_v27, %v715_v10  ;;  %v868_v30 = vpop.f32.mrb[34].mxu0  ;;  %v878_v31 = vpop.f32.mrb[2].mxu1 }
 0x216   : > { %v943_v32 = vmax.f32 %v865_v24, 0.0  ;;  %v869_v33 = vadd.f32 %v868_v30, %v710_v9  ;;  %v879_v34 = vadd.f32 %v878_v31, %v720_v11  ;;  %v870_v35 = vpop.f32.mrb[35].mxu0  ;;  %v880_v36 = vpop.f32.mrb[3].mxu1  ;;  %v947_v41 = vmax.f32 %v875_v25, 0.0 }
 0x217   : > { %v944_v38 = vmax.f32 %v867_v28, 0.0  ;;  %v871_v39 = vadd.f32 %v870_v35, %v710_v9  ;;  %v881_v40 = vadd.f32 %v880_v36, %v720_v11  ;;  %v948_v43 = vmax.f32 %v877_v29, 0.0  ;;  %v755_v22 = vpop.permute.xlu0 %754 }
 0x218   : > { %v945_v42 = vmax.f32 %v869_v33, 0.0  ;;  %v1071_v45 = vmul.f32 %v994_v12, %v943_v32  ;;  %v949_v47 = vmax.f32 %v879_v34, 0.0  ;;  %v1075_v53 = vmul.f32 %v1004_v15, %v947_v41 }
 0x219   : > { %v946_v44 = vmax.f32 %v871_v39, 0.0  ;;  %v1072_v48 = vmul.f32 %v994_v12, %v944_v38  ;;  %v950_v50 = vmax.f32 %v881_v40, 0.0  ;;  %v1076_v58 = vmul.f32 %v1004_v15, %v948_v43 }
 0x21a   : > { %v1073_v46 = vmul.f32 %v999_v13, %v945_v42  ;;  %v1077_v62 = vmul.f32 %v1009_v17, %v949_v47 }
 0x21b   : > { %v1074_v49 = vmul.f32 %v999_v13, %v946_v44  ;;  %v884_v51 = vpop.f32.mrb[4].mxu1  ;;  %v1078_v4 = vmul.f32 %v1009_v17, %v950_v50  ;;  %v760_v35 = vpop.permute.xlu0 %759 }
 0x21c   : > { %v1103_v54 = vadd.f32 %v1073_v46, %v1071_v45  ;;  %v885_v55 = vadd.f32 %v884_v51, %v725_v14  ;;  %v886_v56 = vpop.f32.mrb[5].mxu1 }
 0x21d   : > { %v1124_v59 = vadd.f32 %v1074_v49, %v1072_v48  ;;  %v887_v60 = vadd.f32 %v886_v56, %v725_v14  ;;  %v888_v61 = vpop.f32.mrb[6].mxu1  ;;  %v1034_v14 = vpop.permute.xlu1 %1033 }
 0x21e   : > { %v1104_v63 = vadd.f32 %v1103_v54, %v1075_v53  ;;  %v951_v0 = vmax.f32 %v885_v55, 0.0  ;;  %v889_v1 = vadd.f32 %v888_v61, %v730_v16  ;;  %v890_v3 = vpop.f32.mrb[7].mxu1 }
 0x21f   : > { %v1125_v5 = vadd.f32 %v1124_v59, %v1076_v58  ;;  %v952_v6 = vmax.f32 %v887_v60, 0.0  ;;  %v891_v7 = vadd.f32 %v890_v3, %v730_v16 }
 0x220   : > { %v1105_v8 = vadd.f32 %v1104_v63, %v1077_v62  ;;  %v1079_v9 = vmul.f32 %v1014_v19, %v951_v0  ;;  %v953_v10 = vmax.f32 %v889_v1, 0.0 }
 0x221   : > { %v1126_v11 = vadd.f32 %v1125_v5, %v1078_v4  ;;  %v1080_v12 = vmul.f32 %v1014_v19, %v952_v6  ;;  %v954_v13 = vmax.f32 %v891_v7, 0.0 }
 0x222   : > { %v1106_v15 = vadd.f32 %v1105_v8, %v1079_v9  ;;  %v1081_v23 = vmul.f32 %v1019_v2, %v953_v10 }
 0x223   : > { %v1127_v24 = vadd.f32 %v1126_v11, %v1080_v12  ;;  %v1082_v25 = vmul.f32 %v1019_v2, %v954_v13  ;;  %v894_v26 = vpop.f32.mrb[8].mxu1  ;;  %v1039_v2 = vpop.permute.xlu1 %1038 }
 0x224   : > { %v1107_v27 = vadd.f32 %v1106_v15, %v1081_v23  ;;  %v895_v28 = vadd.f32 %v894_v26, %v1760_v18  ;;  %v896_v17 = vpop.f32.mrb[9].mxu1 }
 0x225   : > { %v1128_v29 = vadd.f32 %v1127_v24, %v1082_v25  ;;  %v897_v16 = vadd.f32 %v896_v17, %v1760_v18  ;;  %v898_v30 = vpop.f32.mrb[10].mxu1 }
 0x226   : > { %v955_v31 = vmax.f32 %v895_v28, 0.0  ;;  %v899_v32 = vadd.f32 %v898_v30, %v1762_v20  ;;  %v900_v19 = vpop.f32.mrb[11].mxu1 }
 0x227   : > { %v956_v33 = vmax.f32 %v897_v16, 0.0  ;;  %v901_v34 = vadd.f32 %v900_v19, %v1762_v20  ;;  %v765_v20 = vpop.permute.xlu0 %764 }
 0x228   : > { %v1083_v36 = vmul.f32 %v1024_v37, %v955_v31  ;;  %v957_v38 = vmax.f32 %v899_v32, 0.0 }
 0x229   : > { %v1084_v39 = vmul.f32 %v1024_v37, %v956_v33  ;;  %v958_v40 = vmax.f32 %v901_v34, 0.0  ;;  %v1044_v37 = vpop.permute.xlu1 %1043 }
 0x22a   : > { %v1108_v41 = vadd.f32 %v1107_v27, %v1083_v36  ;;  %v1085_v42 = vmul.f32 %v1029_v57, %v957_v38 }
 0x22b   : > { %v1129_v43 = vadd.f32 %v1128_v29, %v1084_v39  ;;  %v1086_v44 = vmul.f32 %v1029_v57, %v958_v40  ;;  %v904_v45 = vpop.f32.mrb[12].mxu1 }
 0x22c   : > { %v1109_v18 = vadd.f32 %v1108_v41, %v1085_v42  ;;  %v905_v46 = vadd.f32 %v904_v45, %v1764_v21  ;;  %v906_v47 = vpop.f32.mrb[13].mxu1 }
 0x22d   : > { %v1130_v48 = vadd.f32 %v1129_v43, %v1086_v44  ;;  %v907_v49 = vadd.f32 %v906_v47, %v1764_v21  ;;  %v908_v50 = vpop.f32.mrb[14].mxu1  ;;  %v770_v21 = vpop.permute.xlu0 %769 }
 0x22e   : > { %v959_v51 = vmax.f32 %v905_v46, 0.0  ;;  %v909_v53 = vadd.f32 %v908_v50, %v1766_v52  ;;  %v910_v54 = vpop.f32.mrb[15].mxu1  ;;  %v1049_v6 = vpop.permute.xlu1 %1048 }
 0x22f   : > { %v960_v55 = vmax.f32 %v907_v49, 0.0  ;;  %v911_v56 = vadd.f32 %v910_v54, %v1766_v52 }
 0x230   : > { %v1087_v58 = vmul.f32 %v1034_v14, %v959_v51  ;;  %v961_v57 = vmax.f32 %v909_v53, 0.0 }
 0x231   : > { %v1088_v59 = vmul.f32 %v1034_v14, %v960_v55  ;;  %v962_v60 = vmax.f32 %v911_v56, 0.0  ;;  %v775_v25 = vpop.permute.xlu0 %774 }
 0x232   : > { %v1110_v61 = vadd.f32 %v1109_v18, %v1087_v58  ;;  %v1089_v62 = vmul.f32 %v1039_v2, %v961_v57  ;;  %v1054_v28 = vpop.permute.xlu1 %1053 }
 0x233   : > { %v1131_v63 = vadd.f32 %v1130_v48, %v1088_v59  ;;  %v1090_v0 = vmul.f32 %v1039_v2, %v962_v60  ;;  %v914_v1 = vpop.f32.mrb[16].mxu1 }
 0x234   : > { %v1111_v3 = vadd.f32 %v1110_v61, %v1089_v62  ;;  %v915_v4 = vadd.f32 %v914_v1, %v755_v22  ;;  %v916_v5 = vpop.f32.mrb[17].mxu1 }
 0x235   : > { %v1132_v7 = vadd.f32 %v1131_v63, %v1090_v0  ;;  %v917_v8 = vadd.f32 %v916_v5, %v755_v22  ;;  %v918_v9 = vpop.f32.mrb[18].mxu1  ;;  %v780_v41 = vpop.permute.xlu0 %779 }
 0x236   : > { %v963_v10 = vmax.f32 %v915_v4, 0.0  ;;  %v919_v11 = vadd.f32 %v918_v9, %v760_v35  ;;  %v920_v52 = vpop.f32.mrb[19].mxu1  ;;  %v1059_v42 = vpop.permute.xlu1 %1058 }
 0x237   : > { %v964_v12 = vmax.f32 %v917_v8, 0.0  ;;  %v921_v13 = vadd.f32 %v920_v52, %v760_v35 }
 0x238   : > { %v1091_v15 = vmul.f32 %v1044_v37, %v963_v10  ;;  %v965_v23 = vmax.f32 %v919_v11, 0.0 }
 0x239   : > { %v1092_v14 = vmul.f32 %v1044_v37, %v964_v12  ;;  %v966_v24 = vmax.f32 %v921_v13, 0.0  ;;  %v1064_v58 = vpop.permute.xlu0 %1063  ;;  %v1437_v12 = vmov 1966171168  }
 0x23a   : > { %v1112_v26 = vadd.f32 %v1111_v3, %v1091_v15  ;;  %v1093_v27 = vmul.f32 %v1049_v6, %v965_v23  ;;  %v1069_v62 = vpop.permute.xlu1 %1068  ;;  %v1153_v13 = vunpack.c.l.s4 %v1437_v12  ;;  %v1155_v15 = vlaneseq }
 0x23b   : > { %v1133_v17 = vadd.f32 %v1132_v7, %v1092_v14  ;;  %v1094_v29 = vmul.f32 %v1049_v6, %v966_v24  ;;  %v924_v16 = vpop.f32.mrb[20].mxu1 }
 0x23c   : > { %v1113_v30 = vadd.f32 %v1112_v26, %v1093_v27  ;;  %v925_v31 = vadd.f32 %v924_v16, %v765_v20  ;;  %v926_v22 = vpop.f32.mrb[21].mxu1  ;;  %v1154_v27 = vunpack.c.0.s8 %v1153_v13  ;;  %vm1169_vm1 = vcmp.lt.s32.totalorder %v1155_v15, 256 }
 0x23d   : > { %v1134_v32 = vadd.f32 %v1133_v17, %v1094_v29  ;;  %v927_v19 = vadd.f32 %v926_v22, %v765_v20  ;;  %v928_v33 = vpop.f32.mrb[22].mxu1 }
 0x23e   : > { %v967_v34 = vmax.f32 %v925_v31, 0.0  ;;  %v929_v36 = vadd.f32 %v928_v33, %v770_v21  ;;  %v930_v35 = vpop.f32.mrb[23].mxu1 }
 0x23f   : > { %v968_v38 = vmax.f32 %v927_v19, 0.0  ;;  %v931_v2 = vadd.f32 %v930_v35, %v770_v21 }
 0x240   : > { %v1095_v39 = vmul.f32 %v1054_v28, %v967_v34  ;;  %v969_v40 = vmax.f32 %v929_v36, 0.0 }
 0x241   : > { %v1096_v43 = vmul.f32 %v1054_v28, %v968_v38  ;;  %v970_v44 = vmax.f32 %v931_v2, 0.0  ;;  %v1156_v28 = vshrl.u32 %v1155_v15, 7 }
 0x242   : > { %v1114_v45 = vadd.f32 %v1113_v30, %v1095_v39  ;;  %v1097_v18 = vmul.f32 %v1059_v42, %v969_v40 }
 0x243   : > { %v1135_v46 = vadd.f32 %v1134_v32, %v1096_v43  ;;  %v1098_v47 = vmul.f32 %v1059_v42, %v970_v44  ;;  %v934_v48 = vpop.f32.mrb[24].mxu1  ;;  %v1157_v31 = vsub.s32 %v1154_v27, %v1156_v28 }
 0x244   : > { %v1115_v49 = vadd.f32 %v1114_v45, %v1097_v18  ;;  %v935_v50 = vadd.f32 %v934_v48, %v775_v25  ;;  %v936_v20 = vpop.f32.mrb[25].mxu1 }
 0x245   : > { %v1136_v51 = vadd.f32 %v1135_v46, %v1098_v47  ;;  %v937_v53 = vadd.f32 %v936_v20, %v775_v25  ;;  %v938_v54 = vpop.f32.mrb[26].mxu1  ;;  %v1146_v25 = vstv %s1145_s30 }
 0x246   : > { %v971_v37 = vmax.f32 %v935_v50, 0.0  ;;  %v939_v55 = vadd.f32 %v938_v54, %v780_v41  ;;  %v940_v56 = vpop.f32.mrb[27].mxu1 }
 0x247   : > { %v972_v57 = vmax.f32 %v937_v53, 0.0  ;;  %v941_v59 = vadd.f32 %v940_v56, %v780_v41 }
 0x248   : > { %v1099_v60 = vmul.f32 %v1064_v58, %v971_v37  ;;  %v973_v61 = vmax.f32 %v939_v55, 0.0 }
 0x249   : > { %v1100_v63 = vmul.f32 %v1064_v58, %v972_v57  ;;  %v974_v0 = vmax.f32 %v941_v59, 0.0 }
 0x24a   : > { %v1116_v1 = vadd.f32 %v1115_v49, %v1099_v60  ;;  %v1101_v21 = vmul.f32 %v1069_v62, %v973_v61 }
 0x24b   : > { %v1137_v3 = vadd.f32 %v1136_v51, %v1100_v63  ;;  %v1102_v4 = vmul.f32 %v1069_v62, %v974_v0 }
 0x24c   : > { %v1117_v5 = vadd.f32 %v1116_v1, %v1101_v21 }
 0x24d   : > { %v1138_v6 = vadd.f32 %v1137_v3, %v1102_v4 }
 0x24e   : > { %v1118_v7 = vrot.slane %v1117_v5, 4 }
 0x24f   : > { %v1139_v8 = vrot.slane %v1138_v6, 4 }
 0x250   : > { %v1119_v9 = vadd.f32 %v1118_v7, %v1117_v5 }
 0x251   : > { %v1140_v10 = vadd.f32 %v1139_v8, %v1138_v6 }
 0x252   : > { %v1120_v11 = vrot.slane %v1119_v9, 2 }
 0x253   : > { %v1141_v52 = vrot.slane %v1140_v10, 2 }
 0x254   : > { %v1121_v23 = vadd.f32 %v1120_v11, %v1119_v9 }
 0x255   : > { %v1142_v14 = vadd.f32 %v1141_v52, %v1140_v10 }
 0x256   : > { %v1122_v24 = vrot.slane %v1121_v23, 1 }
 0x257   : > { %v1143_v26 = vrot.slane %v1142_v14, 1 }
 0x258   : > { %v1123_v17 = vadd.f32 %v1122_v24, %v1121_v23 }
 0x259   : > { %v1144_v29 = vadd.f32 %v1143_v26, %v1142_v14 }
 0x25a   : > { %v1147_v16 = vadd.f32 %v1146_v25, %v1123_v17 }
 0x25b   : > { %v1148_v30 = vadd.f32 %v1146_v25, %v1144_v29 }
 0x25d   : > { %v1151_v22 = vcombine.low %v1147_v16, %v1148_v30 }
 0x25f   : > { %v1158_v32 = vrot.slane %v1151_v22, %v1157_v31 }
 0x261   : > { %v1165_v19 = vrot.slane %v1158_v32, %v1157_v31 }
 0x263   : > { %1171 = vst.msk [vmem:[%s316_s14] sm:$0x3] %vm1169_vm1, %v1165_v19 }
 0x264   : > { %1385 = shalt.err (!%p1382_p5)
}
 0x265   : > { %s1386_s21 = scalar_lea.hbm %s1782_s18, 32  ;;  %s1390_s30 = scalar_lea.hbm %s1833_s7, 64 }
 0x266   : > { %p1387_p7 = scmp.ne.s32.totalorder %s1782_s18, %s1386_s21  ;;  %p1391_p12 = scmp.lt.u32.totalorder %s1782_s18, %s1833_s7 }
 0x267   : > { %p1392_p13 = scmp.lt.u32.totalorder %s1390_s30, %s1386_s21  ;;  %p1394_p1 = scmp.lt.u32.totalorder %s1386_s21, %s1782_s18 }
 0x268   : > { %p1388_p10 = pnand %p1387_p7, %p1520_p6 }
 0x269   : > { %p1393_p0 = por %p1392_p13, %p1391_p12 }
 0x26a   : > { %p1389_p11 = pneg %p1388_p10 }
 0x26b   : > { %p1395_p2 = por %p1394_p1, %p1393_p0 }
 0x26d   : > { %p1396_p3 = pnand %p1395_p2, %p1389_p11 }
 0x26f   : > { %1399 = shalt.err (!%p1396_p3)
}
 0x270   : > { %1310 = dma.vmem_to_hbm [thread:$0]  (%p1520_p6), %s1784_s15, 32, %s1782_s18, %s1173_s19  }
 0x271 PF: > { %s1199_s14 = sand.u32 1, %s1422_s26   ;;  %p1313_p4 = pnand %p1254_p9, %p1524_p8 }
 0x272   : > { %s1200_s16 = scalar_lea.sflag [#allocation5], %s1199_s14 }
 0x273   : > { %1417 = dma.done.wait (!%p1313_p4), %s1200_s16, 32  }
 0x274   : > { %1419 = vsyncadd (!%p1313_p4), %s1200_s16, 4294967264  ;;  %p18_p5 = scmp.ge.s32.totalorder %s1505_s8, 4   ;;  %s1836_s26 = smov %s1426_s27 }
 0x275   : > { %s1837_s27 = smov %s1430_s28  ;;  %s1838_s28 = smov %s1518_s11 }
 0x276   : > { %s1839_s29 = smov %s1505_s8  ;;  %20 = sbr.rel (!%p18_p5) target bundleno = 5 (0x5), region = 126 }
 0x27d   :  { %1205 = vsyncpa [#allocation5], 1 }
 0x27e   :  { %1207 = vsyncpa [#allocation5 + $0x1], 1 }

</bundles_post_ra>
